<compile_context>
chip_gen: v7x
topology: tpu7x:2x2x1
jax: 0.10.0
libtpu: 0.0.40
codegen_flags: <defaults>
</compile_context>

<pallas_src>
import functools

import jax
import jax.numpy as jnp
from jax.experimental import pallas as pl
from jax.experimental.pallas import tpu as pltpu

_INF = 10000000000000.0  # matches MaxPoolWithMask.inf


def _masked_maxpool_kernel(x_ref, bias_ref, o_ref, *, block_ts, seq_rem,
                           num_seq_blocks):
    # x_ref:    (BT, TS, TC) input tile, native dtype
    # bias_ref: (BT, TS, 1)  additive mask bias (0 or -1e13), native dtype
    # o_ref:    (BT, TC)     resident f32 output / max accumulator
    s = pl.program_id(2)
    masked = x_ref[...] + bias_ref[...]          # broadcast over channels

    if seq_rem:
        # Unpadded seq tail on the last seq block: the out-of-bounds rows hold
        # garbage (possibly NaN/Inf), so force them to a hard -inf.
        limit = jnp.where(s == pl.num_programs(2) - 1, seq_rem, block_ts)
        pos = jax.lax.broadcasted_iota(
            jnp.int32, (masked.shape[0], block_ts, 1), 1)
        masked = jnp.where(pos < limit, masked,
                           jnp.asarray(-jnp.inf, dtype=masked.dtype))

    partial = jnp.max(masked, axis=1).astype(jnp.float32)   # (BT, TC)

    if num_seq_blocks == 1:
        o_ref[...] = partial
    else:
        @pl.when(s == 0)
        def _first():
            o_ref[...] = partial

        @pl.when(s > 0)
        def _accumulate():
            o_ref[...] = jnp.maximum(o_ref[...], partial)


def _cdiv(n, m):
    return (n + m - 1) // m


def _round_up(n, m):
    return _cdiv(n, m) * m


def max_pool_with_mask(tensor, mask, dim=1, *, max_block_bytes=8 * 1024 * 1024):
    """tensor: [B, S, C] float32/bf16; mask: [B, S] 0/1 (any int/float dtype)."""
    assert dim == 1, "kernel implemented for pooling over the seq dim (dim=1)"
    B, S, C = tensor.shape
    itemsize = jnp.dtype(tensor.dtype).itemsize

    # ---- tile-size selection -------------------------------------------------
    BT = 8 if B >= 8 else B                       # sublane-dense output stores

    TC = C if C <= 2048 else 512                  # full-C block when it fits
    if _cdiv(B, BT) * _cdiv(C, TC) == 1 and C > 128:
        # Guarantee >=2 steps on the 'parallel' axes so both v7x TCs get work.
        TC = max(128, _round_up(_cdiv(C, 2), 128))

    # Seq tile: budget by the real dtype; count the lane-padded bias block too.
    budget_elems = max(1, max_block_bytes // itemsize)
    per_seq_elems = BT * (_round_up(TC, 128) + 128)
    ts_cap = max(8, (budget_elems // per_seq_elems) // 8 * 8)
    TS = S if S <= ts_cap else ts_cap

    grid = (_cdiv(B, BT), _cdiv(C, TC), _cdiv(S, TS))

    # ---- fold mask to a tiny additive bias (no full-tensor pad / copy) --------
    # TODO(synk): dim != 1 would need a transpose; the fastNLP module only calls dim=1.
    bias = jnp.where(mask.astype(jnp.float32) > 0.5, 0.0, -_INF)
    bias = bias.astype(tensor.dtype).reshape(B, S, 1)

    kernel = functools.partial(
        _masked_maxpool_kernel,
        block_ts=TS,
        seq_rem=S % TS,
        num_seq_blocks=grid[2],
    )

    return pl.pallas_call(
        kernel,
        out_shape=jax.ShapeDtypeStruct((B, C), jnp.float32),
        grid_spec=pltpu.PrefetchScalarGridSpec(
            num_scalar_prefetch=0,
            grid=grid,
            in_specs=[
                pl.BlockSpec((BT, TS, TC), lambda b, c, s: (b, s, c)),
                pl.BlockSpec((BT, TS, 1), lambda b, c, s: (b, s, 0)),
            ],
            out_specs=pl.BlockSpec((BT, TC), lambda b, c, s: (b, c)),
        ),
        compiler_params=pltpu.CompilerParams(
            dimension_semantics=("parallel", "parallel", "arbitrary"),
            vmem_limit_bytes=48 * 1024 * 1024,
        ),
    )(tensor, bias)


def _reference(tensor, mask):
    masks = mask.astype(jnp.float32)[:, :, None]
    masks = jnp.broadcast_to(masks, tensor.shape)
    return jnp.max(
        tensor.astype(jnp.float32) + (masks <= 0.5).astype(jnp.float32) * (-_INF),
        axis=1,
    )


if __name__ == "__main__":
    key = jax.random.PRNGKey(0)

    def run_case(k, B, S, C, **kw):
        k1, k2 = jax.random.split(k)
        x = jax.random.normal(k1, (B, S, C), dtype=jnp.float32)
        m = (jax.random.uniform(k2, (B, S)) > 0.4).astype(jnp.int32)
        m = m.at[:, 0].set(1)  # at least one unmasked position per row
        out = max_pool_with_mask(x, m, dim=1, **kw)
        jax.block_until_ready(out)
        ref = _reference(x, m)
        assert out.shape == (B, C), out.shape
        assert jnp.allclose(out, ref, atol=1e-5, rtol=1e-5), ("mismatch", B, S, C)

    ks = jax.random.split(key, 3)
    # Small shape matching the module's forward signature (single-step path,
    # no padding anywhere).
    run_case(ks[0], B=2, S=8, C=32)
    # Batch remainder (B=10 with BT=8 cdiv grid) and non-128-multiple channels,
    # handled purely by Pallas boundary clipping — no wrapper-side jnp.pad.
    run_case(ks[1], B=10, S=300, C=200)
    # Tiny block budget: exercises the parallel-axis channel split, seq tiling
    # with a non-divisible tail (in-kernel -inf validity mask) and multi-step
    # max accumulation.
    run_case(ks[2], B=4, S=100, C=256, max_block_bytes=32 * 1024)

    print("KERNEL_OK")
</pallas_src>

<mosaic_0001>
module attributes {stable_mosaic.version = 11 : i64} {
  func.func @_masked_maxpool_kernel(%arg0: i32, %arg1: i32, %arg2: i32, %arg3: memref<2x8x32xf32, #tpu.memory_space<vmem>>, %arg4: memref<2x8x1xf32, #tpu.memory_space<vmem>>, %arg5: memref<2x32xf32, #tpu.memory_space<vmem>>) attributes {dimension_semantics = [#tpu.dimension_semantics<parallel>, #tpu.dimension_semantics<parallel>, #tpu.dimension_semantics<arbitrary>], iteration_bounds = array<i64: 1, 1, 1>, scalar_prefetch = 0 : i64, scratch_operands = 0 : i64, tpu.core_type = #tpu.core_type<tc>, window_params = [{transform_indices = @transform_0, window_bounds = array<i64: 2, 8, 32>}, {transform_indices = @transform_1, window_bounds = array<i64: 2, 8, 1>}, {transform_indices = @transform_2, window_bounds = array<i64: 2, 32>}]} {
    %c0 = arith.constant 0 : index
    %c0_0 = arith.constant 0 : index
    %c0_1 = arith.constant 0 : index
    %0 = vector.load %arg3[%c0, %c0_0, %c0_1] : memref<2x8x32xf32, #tpu.memory_space<vmem>>, vector<2x8x32xf32>
    %c0_2 = arith.constant 0 : index
    %c0_3 = arith.constant 0 : index
    %c0_4 = arith.constant 0 : index
    %1 = vector.load %arg4[%c0_2, %c0_3, %c0_4] : memref<2x8x1xf32, #tpu.memory_space<vmem>>, vector<2x8x1xf32>
    %2 = vector.broadcast %1 : vector<2x8x1xf32> to vector<2x8x32xf32>
    %3 = arith.addf %0, %2 : vector<2x8x32xf32>
    %cst = arith.constant dense<0xFF800000> : vector<2x32xf32>
    %4 = vector.multi_reduction <maximumf>, %3, %cst [1] : vector<2x8x32xf32> to vector<2x32xf32>
    %c0_5 = arith.constant 0 : index
    %c0_6 = arith.constant 0 : index
    %5 = vector.load %arg5[%c0_5, %c0_6] : memref<2x32xf32, #tpu.memory_space<vmem>>, vector<2x32xf32>
    tpu.vector_store %arg5[%c0_5, %c0_6], %4 {strides = array<i32>} : memref<2x32xf32, #tpu.memory_space<vmem>>, vector<2x32xf32>,
    return
  }
  func.func @transform_0(%arg0: i32, %arg1: i32, %arg2: i32) -> (i32, i32, i32) {
    %c0_i32 = arith.constant 0 : i32
    return %arg0, %arg2, %arg1 : i32, i32, i32
  }
  func.func @transform_1(%arg0: i32, %arg1: i32, %arg2: i32) -> (i32, i32, i32) {
    %c0_i32 = arith.constant 0 : i32
    %c0_i32_0 = arith.constant 0 : i32
    return %arg0, %arg2, %c0_i32 : i32, i32, i32
  }
  func.func @transform_2(%arg0: i32, %arg1: i32, %arg2: i32) -> (i32, i32) {
    %c0_i32 = arith.constant 0 : i32
    return %arg0, %arg1 : i32, i32
  }
}

</mosaic_0001>

<bundles_post_ra>
// kernel: tpu_custom_call.1
= control target key start
LH: loop header
LB: loop body
LE: loop exit
PB: predicated region body
PF: predicated region fallthrough
CT: control target
= control target key end

     0   :  { %s132_s0 = inlined_call_operand.vmem [shape: f32[2,8,32], index: 0, kind: input, shape index: {}]   ;;  %s133_s1 = inlined_call_operand.vmem [shape: f32[2,8,1], index: 1, kind: input, shape index: {}]   ;;  %s134_s2 = inlined_call_operand.hbm [shape: f32[2,32], index: 2, kind: output, shape index: {}]  }
   0x1   :  { %v14_v0 = vld [vmem:[%s133_s1] sm:$0xff] }
   0x2   :  { %7 = vsyncpa [#allocation3], 0  ;;  %v91_v1 = vmov 0   ;;  %v15_v2 = vld [vmem:[%s133_s1 + $0x8] sm:$0xff]  ;;  %v12_v3 = vld [vmem:[%s132_s0] sm:$0xff]  ;;  %vm28_vm0 = vcmask 261120  }
   0x3   :  { %66 = vset.pattern.permute.xlu0 %v91_v1  ;;  %v13_v6 = vld [vmem:[%s132_s0 + $0x8] sm:$0xff]  ;;  %s92_s1 = smov [#allocation2]   ;;  %vm45_vm1 = vcmask 1041409   ;;  %vm48_vm2 = vcmask 254976  }
   0x4   :  { %18 = vperm.xlu0 %66, %v14_v0   ;;  %s56_s17 = sshll.u32 %s92_s1, 4  ;;  %s57_s17 = int_to_ptr.vmem [resolvable:$true] %s56_s17 }
   0x5   :  { %s67_s0 = scalar_lea.vmem %s57_s17, 32  ;;  %p72_p1 = scmp.lt.s32.totalorder %s57_s17, %s57_s17 }
   0x6   :  { %p68_p0 = scmp.ne.s32.totalorder %s57_s17, %s67_s0  ;;  %p73_p2 = scmp.lt.s32.totalorder %s67_s0, %s67_s0 }
   0x8   :  { %23 = vperm.xlu0 %66, %v15_v2   ;;  %p74_p3 = por %p73_p2, %p72_p1 }
   0xa   :  { %p75_p4 = pnand %p74_p3, %p68_p0 }
  0x83   :  { %v19_v4 = vpop.permute.xlu0 %18 }
  0x84   :  { %v26_v5 = vadd.f32 %v19_v4, %v12_v3 }
  0x86   :  { %v29_v7 = vsel %vm28_vm0, %v26_v5, -inf }
  0x87   :  { %v30_v8 = vrot.slane %v29_v7, 4  ;;  %v24_v9 = vpop.permute.xlu0 %23 }
  0x88   :  { %v27_v10 = vadd.f32 %v24_v9, %v13_v6 }
  0x89   :  { %v31_v11 = vmax.f32 %v29_v7, %v30_v8 }
  0x8a   :  { %v36_v12 = vsel %vm28_vm0, %v27_v10, -inf }
  0x8b   :  { %v32_v13 = vrot.slane %v31_v11, 2  ;;  %v37_v14 = vrot.slane %v36_v12, 4 }
  0x8d   :  { %v33_v15 = vmax.f32 %v31_v11, %v32_v13  ;;  %v38_v16 = vmax.f32 %v36_v12, %v37_v14 }
  0x8f   :  { %v39_v17 = vrot.slane %v38_v16, 2  ;;  %v34_v18 = vrot.slane %v33_v15, 1 }
  0x91   :  { %v40_v19 = vmax.f32 %v38_v16, %v39_v17  ;;  %v35_v21 = vmax.f32 %v33_v15, %v34_v18 }
  0x93   :  { %v41_v20 = vrot.slane %v40_v19, 1 }
  0x95   :  { %v42_v22 = vmax.f32 %v40_v19, %v41_v20 }
  0x97   :  { %v46_v23 = vsel %vm45_vm1, %v42_v22, %v35_v21 }
  0x98   :  { %49 = vst.msk [vmem:[#allocation2] sm:$0x3] %vm48_vm2, %v46_v23 }
  0x99   :  { %78 = shalt.err (!%p75_p4)
}
  0x9a   :  { %s79_s20 = scalar_lea.hbm %s134_s2, 32 }
  0x9b   :  { %p80_p5 = scmp.ne.s32.totalorder %s134_s2, %s79_s20  ;;  %p83_p6 = scmp.lt.u32.totalorder %s79_s20, %s134_s2 }
  0x9d   :  { %p85_p7 = pnand %p83_p6, %p80_p5 }
  0x9f   :  { %88 = shalt.err (!%p85_p7)
}
  0xa0   :  { %59 = dma.vmem_to_hbm [thread:$0]  %s57_s17, 32, %s134_s2, [#allocation3]  }
  0xa1   :  { %89 = dma.done.wait [#allocation3], 32  }
  0xa2   :  { %90 = vsyncadd [#allocation3], 4294967264 }
  0xa3   :  { %63 = vsyncpa [#allocation3], 1 }

</bundles_post_ra>
